<compile_context>
chip_gen: v5e
topology: v5e:2x2
jax: 0.10.0
libtpu: 0.0.40
codegen_flags: <defaults>
</compile_context>

<pallas_src>
import functools
from typing import NamedTuple

import jax
import jax.numpy as jnp
from jax import lax
from jax.experimental import pallas as pl
from jax.experimental.pallas import tpu as pltpu

EPS = 1e-5
LANE = 128            # vreg lane width   (last dim)
SUBLANE_BF16 = 16     # bf16 packs 16 sublanes per vreg (second-to-last dim)
_MB = 1024 * 1024

# Per-TensorCore VMEM: 128 MiB on v5e/v6e, 64 MiB on v7x.  Query it; fall back to the
# conservative v7x figure, and only ever ask Mosaic for ~75% so it keeps headroom for
# its internal scratch and double-buffers.
try:
    _VMEM_CAP = int(getattr(pltpu.get_tpu_info(), "vmem_capacity_bytes", 64 * _MB))
except Exception:  # pragma: no cover - conservative fallback
    _VMEM_CAP = 64 * _MB
_VMEM_BUDGET = (_VMEM_CAP * 3) // 4


def _round_up(x, m):
    return (x + m - 1) // m * m


def _vmem_limit(request_bytes):
    return int(min(_VMEM_BUDGET, max(request_bytes, 32 * _MB)))


def _fused_request(n_pad, in_pad, out_pads, gb_pad):
    max_pad = max((in_pad,) + tuple(out_pads))
    w_bytes = sum(k * o * 2 for k, o in zip((in_pad,) + tuple(out_pads[:-1]), out_pads))
    io = n_pad * in_pad * 2 + n_pad * out_pads[-1] * 4 + 8 * gb_pad * 4
    act = n_pad * max_pad * 4 * 3                      # z / a / bf16-h temporaries
    return int((w_bytes + io + act) * 5 // 4) + 4 * _MB


def _tiled_request(tile_m, in_pad, out_pad):
    tiles = (tile_m * in_pad * 2 + tile_m * out_pad * 4) * 2   # double-buffered blocks
    w_bytes = in_pad * out_pad * 2 * 2
    work = tile_m * out_pad * 4 * 3
    return int((tiles + w_bytes + work) * 5 // 4) + 4 * _MB


# --------------------------------------------------------------------------------------
# Kernels
# --------------------------------------------------------------------------------------
def _make_fused_kernel(n_valid, n_pad, out_pads):
    """Whole-batch fused 4-layer kernel (single block, no grid)."""
    inv_n = 1.0 / float(n_valid)
    mask_rows = n_pad != n_valid

    def kernel(x_ref, w1_ref, w2_ref, w3_ref, w4_ref, gb_ref, o_ref):
        w_refs = (w1_ref, w2_ref, w3_ref, w4_ref)
        if mask_rows:
            row_mask = (lax.broadcasted_iota(jnp.int32, (n_pad, 1), 0)
                        < n_valid).astype(jnp.float32)
        h = x_ref[...]                                   # bf16 MXU operand
        for i, w_ref in enumerate(w_refs):
            op = out_pads[i]
            # Linear (bias omitted: cancelled exactly by BN's batch-mean subtraction).
            z = jnp.dot(h, w_ref[...], preferred_element_type=jnp.float32)
            # Padded rows/cols of z are exactly 0, so unmasked sums are exact.
            s1 = jnp.sum(z, axis=0, keepdims=True)
            s2 = jnp.sum(z * z, axis=0, keepdims=True)
            mean = s1 * inv_n
            var = jnp.maximum(s2 * inv_n - mean * mean, 0.0)     # f32, clamped
            gamma = gb_ref[2 * i:2 * i + 1, :op]
            beta = gb_ref[2 * i + 1:2 * i + 2, :op]
            scale = gamma * lax.rsqrt(var + EPS)         # gamma folded into the scale
            shift = beta - mean * scale                  # mean folded into the shift
            a = z * scale + shift
            if i < 3:
                a = jnp.maximum(a, 0.0)                  # ReLU on first 3 layers
                if mask_rows:
                    # Padded rows must stay 0 so the next layer's unmasked stats are exact.
                    a = a * row_mask
                h = a.astype(jnp.bfloat16)
        # TODO(synk): emit bf16 here if the downstream consumer tolerates it (halves the
        # already 16x-padded output writeback stream); kept f32 to match module dtype.
        o_ref[...] = a

    return kernel


def _make_layer_kernel(n_valid, tile_m, apply_relu, mask_rows):
    """One Linear+BN(+ReLU) layer, batch-tiled two-pass BN.

    grid = (phase, tile):  phase 0 accumulates sum / sum-of-squares, phase 1 recomputes
    the matmul and applies the normalization (recompute is cheaper than staging z in HBM).
    """
    inv_n = 1.0 / float(n_valid)

    def kernel(h_ref, w_ref, gb_ref, o_ref, s1_ref, s2_ref):
        phase = pl.program_id(0)
        t = pl.program_id(1)

        @pl.when(jnp.logical_and(phase == 0, t == 0))
        def _init():
            s1_ref[...] = jnp.zeros_like(s1_ref)
            s2_ref[...] = jnp.zeros_like(s2_ref)

        @pl.when(phase == 0)
        def _stats():
            z = jnp.dot(h_ref[...], w_ref[...], preferred_element_type=jnp.float32)
            # Column sums on the MXU (it has slack at K<=128); keeps VALU/XLU slots free.
            ones = jnp.ones((1, tile_m), jnp.float32)
            s1_ref[...] += jnp.dot(ones, z, preferred_element_type=jnp.float32)
            s2_ref[...] += jnp.dot(ones, z * z, preferred_element_type=jnp.float32)

        @pl.when(phase == 1)
        def _apply():
            z = jnp.dot(h_ref[...], w_ref[...], preferred_element_type=jnp.float32)
            mean = s1_ref[...] * inv_n
            var = jnp.maximum(s2_ref[...] * inv_n - mean * mean, 0.0)
            scale = gb_ref[0:1, :] * lax.rsqrt(var + EPS)
            shift = gb_ref[1:2, :] - mean * scale
            a = z * scale + shift
            if apply_relu:
                a = jnp.maximum(a, 0.0)
            if mask_rows:
                row = t * tile_m + lax.broadcasted_iota(jnp.int32, (tile_m, 1), 0)
                a = jnp.where(row < n_valid, a, 0.0)     # keep padded rows exactly zero
            o_ref[...] = a.astype(o_ref.dtype)

    return kernel


# --------------------------------------------------------------------------------------
# Parameter prep (one-time) + jitted forward
# --------------------------------------------------------------------------------------
class _MLPMeta(NamedTuple):
    in_dim: int
    out_dims: tuple
    in_pad: int
    out_pads: tuple
    gb_pad: int


def prepare_mlp_params(params):
    """One-time parameter preprocessing, hoisted out of the per-call path.

    params: flat list [w, b, gamma, beta] * 4 with w: (in, out), b/gamma/beta: (1, out).
    The Linear bias is accepted but never used (cancelled by training-mode BN)."""
    ws = [params[4 * i] for i in range(4)]
    gammas = [params[4 * i + 2] for i in range(4)]
    betas = [params[4 * i + 3] for i in range(4)]
    in_dim = int(ws[0].shape[0])
    out_dims = tuple(int(w.shape[1]) for w in ws)
    in_pad = _round_up(in_dim, LANE)
    out_pads = tuple(_round_up(d, LANE) for d in out_dims)
    gb_pad = max(out_pads)

    # Lane-aligned, zero-padded bf16 weights (MXU-native operands).
    w_ps = []
    prev = in_pad
    for w, op in zip(ws, out_pads):
        wp = jnp.zeros((prev, op), jnp.bfloat16)
        wp = wp.at[:w.shape[0], :w.shape[1]].set(w.astype(jnp.bfloat16))
        w_ps.append(wp)
        prev = op

    # Packed gamma/beta slab for the fused kernel (row 2i = gamma_i, 2i+1 = beta_i), plus
    # per-layer (2, out_pad) slabs for the tiled path.  Padded columns stay 0 so padded
    # feature lanes remain exactly 0 through every layer.
    gb_slab = jnp.zeros((8, gb_pad), jnp.float32)
    gb_layers = []
    for i, (g, b, d, op) in enumerate(zip(gammas, betas, out_dims, out_pads)):
        gb_slab = gb_slab.at[2 * i, :d].set(g.reshape(-1))
        gb_slab = gb_slab.at[2 * i + 1, :d].set(b.reshape(-1))
        gbl = jnp.zeros((2, op), jnp.float32)
        gbl = gbl.at[0, :d].set(g.reshape(-1)).at[1, :d].set(b.reshape(-1))
        gb_layers.append(gbl)

    arrays = {"w": tuple(w_ps), "gb_slab": gb_slab, "gb": tuple(gb_layers)}
    meta = _MLPMeta(in_dim, out_dims, in_pad, out_pads, gb_pad)
    return arrays, meta


def _mlp_forward_impl(x, arrays, *, meta, tile_m, force_tiled):
    n, in_dim = x.shape
    assert in_dim == meta.in_dim, (in_dim, meta.in_dim)
    in_pad, out_pads, out_dims = meta.in_pad, meta.out_pads, meta.out_dims
    w_ps = arrays["w"]

    fused_req = _fused_request(_round_up(n, SUBLANE_BF16), in_pad, out_pads, meta.gb_pad)
    use_fused = (not force_tiled) and fused_req <= _VMEM_BUDGET

    # --------------------------- fused single-block path ----------------------------
    if use_fused:
        n_pad = _round_up(n, SUBLANE_BF16)
        x_p = jnp.zeros((n_pad, in_pad), jnp.bfloat16)
        x_p = x_p.at[:n, :in_dim].set(x.astype(jnp.bfloat16))
        flops = 2 * n_pad * sum(k * o for k, o in zip((in_pad,) + out_pads[:-1], out_pads))
        bytes_acc = (x_p.size * 2 + sum(int(w.size) * 2 for w in w_ps)
                     + arrays["gb_slab"].size * 4 + n_pad * out_pads[-1] * 4)
        out_p = pl.pallas_call(
            _make_fused_kernel(n, n_pad, out_pads),
            out_shape=jax.ShapeDtypeStruct((n_pad, out_pads[-1]), jnp.float32),
            in_specs=[pl.BlockSpec(memory_space=pltpu.MemorySpace.VMEM)] * 6,
            out_specs=pl.BlockSpec(memory_space=pltpu.MemorySpace.VMEM),
            compiler_params=pltpu.CompilerParams(
                vmem_limit_bytes=_vmem_limit(fused_req)),
            cost_estimate=pl.CostEstimate(flops=int(flops),
                                          transcendentals=int(sum(out_pads)),
                                          bytes_accessed=int(bytes_acc)),
        )(x_p, *w_ps, arrays["gb_slab"])
        return out_p[:n, :out_dims[-1]]

    # ------------------------- batch-tiled two-pass BN path -------------------------
    # TODO(synk): splitting phase 1 into its own pallas_call would allow
    # dimension_semantics=("parallel",) there and shard the normalize pass across v7x's
    # two TensorCores; inside a single call the stats carry forces "arbitrary".
    tm = tile_m
    n_pad = _round_up(n, tm)
    n_tiles = n_pad // tm
    mask_rows = n_pad != n

    h = jnp.zeros((n_pad, in_pad), jnp.bfloat16)
    h = h.at[:n, :in_dim].set(x.astype(jnp.bfloat16))

    prev = in_pad
    for i in range(4):
        op = out_pads[i]
        last = i == 3
        out_dtype = jnp.float32 if last else jnp.bfloat16
        flops = 2 * 2 * n_pad * prev * op           # matmul recomputed in both phases
        bytes_acc = (2 * n_pad * prev * 2 + prev * op * 2 + 2 * op * 4
                     + n_pad * op * (4 if last else 2))
        h = pl.pallas_call(
            _make_layer_kernel(n, tm, apply_relu=not last, mask_rows=mask_rows),
            grid=(2, n_tiles),
            out_shape=jax.ShapeDtypeStruct((n_pad, op), out_dtype),
            in_specs=[
                pl.BlockSpec((tm, prev), lambda p, t: (t, 0)),   # batch tile (per phase)
                pl.BlockSpec((prev, op), lambda p, t: (0, 0)),   # weight stays resident
                pl.BlockSpec((2, op), lambda p, t: (0, 0)),      # gamma/beta resident
            ],
            # Phase 0 never writes the output; p*t pins the resident output block to
            # tile 0 during phase 0 (so no garbage writeback), then phase 1 walks tiles.
            out_specs=pl.BlockSpec((tm, op), lambda p, t: (p * t, 0)),
            scratch_shapes=[pltpu.VMEM((1, op), jnp.float32),
                            pltpu.VMEM((1, op), jnp.float32)],
            compiler_params=pltpu.CompilerParams(
                dimension_semantics=("arbitrary", "arbitrary"),
                vmem_limit_bytes=_vmem_limit(_tiled_request(tm, prev, op))),
            cost_estimate=pl.CostEstimate(flops=int(flops), transcendentals=int(op),
                                          bytes_accessed=int(bytes_acc)),
        )(h, w_ps[i], arrays["gb"][i])
        prev = op
    return h[:n, :out_dims[-1]]


def make_mlp_forward(params, *, tile_m=512, force_tiled=False):
    """Returns a jitted forward(x) closing over pre-padded device parameters.

    tile_m: batch tile for the gridded path (multiple of 256 fills the v6e/v7x MXU).
    force_tiled: force the batch-tiled two-pass BN path (otherwise chosen automatically
    when the fused single block would exceed the per-core VMEM budget)."""
    arrays, meta = prepare_mlp_params(params)
    fwd = jax.jit(functools.partial(_mlp_forward_impl, meta=meta, tile_m=tile_m,
                                    force_tiled=force_tiled))
    return lambda x: fwd(x, arrays)


# --------------------------------------------------------------------------------------
# Reference + test harness
# --------------------------------------------------------------------------------------
def init_mlp_params(key, input_dim, hidden_dim, output_dim):
    """Deterministic synthetic parameters matching the PyTorch module's shapes."""
    dims = [(input_dim, hidden_dim), (hidden_dim, hidden_dim),
            (hidden_dim, hidden_dim), (hidden_dim, output_dim)]
    params = []
    for (d_in, d_out) in dims:
        key, kw, kb, kg, kbt = jax.random.split(key, 5)
        w = jax.random.normal(kw, (d_in, d_out), jnp.float32) * (1.0 / jnp.sqrt(d_in))
        b = jax.random.normal(kb, (1, d_out), jnp.float32) * 0.01
        gamma = 1.0 + 0.1 * jax.random.normal(kg, (1, d_out), jnp.float32)
        beta = 0.1 * jax.random.normal(kbt, (1, d_out), jnp.float32)
        params += [w, b, gamma, beta]
    return params


def mlp_reference(x, params):
    """Pure-JAX f32 reference with the exact PyTorch forward math (incl. Linear bias)."""
    h = x
    for i in range(4):
        w, b, g, beta = params[4 * i: 4 * i + 4]
        z = h @ w + b
        mean = jnp.mean(z, axis=0, keepdims=True)
        var = jnp.mean((z - mean) ** 2, axis=0, keepdims=True)
        z = (z - mean) * lax.rsqrt(var + EPS) * g + beta
        h = jnp.maximum(z, 0.0) if i < 3 else z
    return h


if __name__ == "__main__":
    input_dim, hidden_dim, output_dim = 16, 32, 8

    key = jax.random.PRNGKey(0)
    key, kx = jax.random.split(key)
    params = init_mlp_params(key, input_dim, hidden_dim, output_dim)

    mlp = make_mlp_forward(params)                                  # fused single block
    mlp_tiled = make_mlp_forward(params, tile_m=256, force_tiled=True)  # gridded path

    # Case 1: small batch, fused path.
    x8 = jax.random.normal(kx, (8, input_dim), jnp.float32)
    out8 = jax.block_until_ready(mlp(x8))
    ref8 = mlp_reference(x8, params)
    assert out8.shape == (8, output_dim), out8.shape
    assert jnp.allclose(out8, ref8, atol=5e-2, rtol=5e-2), "mismatch vs reference (N=8)"

    # Case 2: ragged batch (exercises padded-row zeroing between layers).
    x6 = x8[:6]
    out6 = jax.block_until_ready(mlp(x6))
    ref6 = mlp_reference(x6, params)
    assert out6.shape == (6, output_dim), out6.shape
    assert jnp.allclose(out6, ref6, atol=5e-2, rtol=5e-2), "mismatch vs reference (N=6)"

    # Case 3: batch-tiled two-pass BN path (4 tiles of 256 rows, last one ragged).
    key, kb = jax.random.split(key)
    xb = jax.random.normal(kb, (1000, input_dim), jnp.float32)
    outb = jax.block_until_ready(mlp_tiled(xb))
    refb = mlp_reference(xb, params)
    assert outb.shape == (1000, output_dim), outb.shape
    assert jnp.allclose(outb, refb, atol=5e-2, rtol=5e-2), "mismatch vs reference (tiled)"

    print("KERNEL_OK")
</pallas_src>

<mosaic_0001>
module attributes {stable_mosaic.version = 11 : i64} {
  func.func @kernel(%arg0: memref<16x128xbf16, #tpu.memory_space<vmem>>, %arg1: memref<128x128xbf16, #tpu.memory_space<vmem>>, %arg2: memref<128x128xbf16, #tpu.memory_space<vmem>>, %arg3: memref<128x128xbf16, #tpu.memory_space<vmem>>, %arg4: memref<128x128xbf16, #tpu.memory_space<vmem>>, %arg5: memref<8x128xf32, #tpu.memory_space<vmem>>, %arg6: memref<16x128xf32, #tpu.memory_space<vmem>>) attributes {dimension_semantics = [], scalar_prefetch = 0 : i64, scratch_operands = 0 : i64, tpu.core_type = #tpu.core_type<tc>} {
    %0 = tpu.iota {dimensions = array<i32: 0>} : vector<16x1xi32>
    %c8_i32 = arith.constant 8 : i32
    %1 = vector.broadcast %c8_i32 : i32 to vector<16x1xi32>
    %2 = arith.cmpi slt, %0, %1 : vector<16x1xi32>
    %3 = arith.extui %2 : vector<16x1xi1> to vector<16x1xi32>
    %4 = arith.sitofp %3 : vector<16x1xi32> to vector<16x1xf32>
    %c0 = arith.constant 0 : index
    %c0_0 = arith.constant 0 : index
    %5 = vector.load %arg0[%c0, %c0_0] : memref<16x128xbf16, #tpu.memory_space<vmem>>, vector<16x128xbf16>
    %c0_1 = arith.constant 0 : index
    %c0_2 = arith.constant 0 : index
    %6 = vector.load %arg1[%c0_1, %c0_2] : memref<128x128xbf16, #tpu.memory_space<vmem>>, vector<128x128xbf16>
    %cst = arith.constant dense<0.000000e+00> : vector<16x128xf32>
    %7 = tpu.matmul %5, %6, %cst {dimension_numbers = #tpu.dot_dimension_numbers<[1], [0], [0], [1], [0, 0, 1, 1], [], []>} : vector<16x128xbf16>, vector<128x128xbf16>, vector<16x128xf32> -> vector<16x128xf32>
    %cst_3 = arith.constant dense<0.000000e+00> : vector<128xf32>
    %8 = vector.multi_reduction <add>, %7, %cst_3 [0] : vector<16x128xf32> to vector<128xf32>
    %9 = vector.shape_cast %8 : vector<128xf32> to vector<1x128xf32>
    %10 = arith.mulf %7, %7 : vector<16x128xf32>
    %cst_4 = arith.constant dense<0.000000e+00> : vector<128xf32>
    %11 = vector.multi_reduction <add>, %10, %cst_4 [0] : vector<16x128xf32> to vector<128xf32>
    %12 = vector.shape_cast %11 : vector<128xf32> to vector<1x128xf32>
    %cst_5 = arith.constant 1.250000e-01 : f32
    %13 = vector.broadcast %cst_5 : f32 to vector<1x128xf32>
    %14 = arith.mulf %9, %13 : vector<1x128xf32>
    %cst_6 = arith.constant 1.250000e-01 : f32
    %15 = vector.broadcast %cst_6 : f32 to vector<1x128xf32>
    %16 = arith.mulf %12, %15 : vector<1x128xf32>
    %17 = arith.mulf %14, %14 : vector<1x128xf32>
    %18 = arith.subf %16, %17 : vector<1x128xf32>
    %cst_7 = arith.constant 0.000000e+00 : f32
    %19 = vector.broadcast %cst_7 : f32 to vector<1x128xf32>
    %20 = arith.maximumf %18, %19 : vector<1x128xf32>
    %c0_8 = arith.constant 0 : index
    %c0_9 = arith.constant 0 : index
    %21 = vector.load %arg5[%c0_8, %c0_9] : memref<8x128xf32, #tpu.memory_space<vmem>>, vector<1x128xf32>
    %c1 = arith.constant 1 : index
    %c0_10 = arith.constant 0 : index
    %22 = vector.load %arg5[%c1, %c0_10] : memref<8x128xf32, #tpu.memory_space<vmem>>, vector<1x128xf32>
    %cst_11 = arith.constant 9.99999974E-6 : f32
    %23 = vector.broadcast %cst_11 : f32 to vector<1x128xf32>
    %24 = arith.addf %20, %23 : vector<1x128xf32>
    %25 = math.rsqrt %24 : vector<1x128xf32>
    %26 = arith.mulf %21, %25 : vector<1x128xf32>
    %27 = arith.mulf %14, %26 : vector<1x128xf32>
    %28 = arith.subf %22, %27 : vector<1x128xf32>
    %29 = vector.broadcast %26 : vector<1x128xf32> to vector<16x128xf32>
    %30 = arith.mulf %7, %29 : vector<16x128xf32>
    %31 = vector.broadcast %28 : vector<1x128xf32> to vector<16x128xf32>
    %32 = arith.addf %30, %31 : vector<16x128xf32>
    %cst_12 = arith.constant 0.000000e+00 : f32
    %33 = vector.broadcast %cst_12 : f32 to vector<16x128xf32>
    %34 = arith.maximumf %32, %33 : vector<16x128xf32>
    %35 = vector.broadcast %4 : vector<16x1xf32> to vector<16x128xf32>
    %36 = arith.mulf %34, %35 : vector<16x128xf32>
    %37 = arith.truncf %36 : vector<16x128xf32> to vector<16x128xbf16>
    %c0_13 = arith.constant 0 : index
    %c0_14 = arith.constant 0 : index
    %38 = vector.load %arg2[%c0_13, %c0_14] : memref<128x128xbf16, #tpu.memory_space<vmem>>, vector<128x128xbf16>
    %cst_15 = arith.constant dense<0.000000e+00> : vector<16x128xf32>
    %39 = tpu.matmul %37, %38, %cst_15 {dimension_numbers = #tpu.dot_dimension_numbers<[1], [0], [0], [1], [0, 0, 1, 1], [], []>} : vector<16x128xbf16>, vector<128x128xbf16>, vector<16x128xf32> -> vector<16x128xf32>
    %cst_16 = arith.constant dense<0.000000e+00> : vector<128xf32>
    %40 = vector.multi_reduction <add>, %39, %cst_16 [0] : vector<16x128xf32> to vector<128xf32>
    %41 = vector.shape_cast %40 : vector<128xf32> to vector<1x128xf32>
    %42 = arith.mulf %39, %39 : vector<16x128xf32>
    %cst_17 = arith.constant dense<0.000000e+00> : vector<128xf32>
    %43 = vector.multi_reduction <add>, %42, %cst_17 [0] : vector<16x128xf32> to vector<128xf32>
    %44 = vector.shape_cast %43 : vector<128xf32> to vector<1x128xf32>
    %cst_18 = arith.constant 1.250000e-01 : f32
    %45 = vector.broadcast %cst_18 : f32 to vector<1x128xf32>
    %46 = arith.mulf %41, %45 : vector<1x128xf32>
    %cst_19 = arith.constant 1.250000e-01 : f32
    %47 = vector.broadcast %cst_19 : f32 to vector<1x128xf32>
    %48 = arith.mulf %44, %47 : vector<1x128xf32>
    %49 = arith.mulf %46, %46 : vector<1x128xf32>
    %50 = arith.subf %48, %49 : vector<1x128xf32>
    %cst_20 = arith.constant 0.000000e+00 : f32
    %51 = vector.broadcast %cst_20 : f32 to vector<1x128xf32>
    %52 = arith.maximumf %50, %51 : vector<1x128xf32>
    %c2 = arith.constant 2 : index
    %c0_21 = arith.constant 0 : index
    %53 = vector.load %arg5[%c2, %c0_21] : memref<8x128xf32, #tpu.memory_space<vmem>>, vector<1x128xf32>
    %c3 = arith.constant 3 : index
    %c0_22 = arith.constant 0 : index
    %54 = vector.load %arg5[%c3, %c0_22] : memref<8x128xf32, #tpu.memory_space<vmem>>, vector<1x128xf32>
    %cst_23 = arith.constant 9.99999974E-6 : f32
    %55 = vector.broadcast %cst_23 : f32 to vector<1x128xf32>
    %56 = arith.addf %52, %55 : vector<1x128xf32>
    %57 = math.rsqrt %56 : vector<1x128xf32>
    %58 = arith.mulf %53, %57 : vector<1x128xf32>
    %59 = arith.mulf %46, %58 : vector<1x128xf32>
    %60 = arith.subf %54, %59 : vector<1x128xf32>
    %61 = vector.broadcast %58 : vector<1x128xf32> to vector<16x128xf32>
    %62 = arith.mulf %39, %61 : vector<16x128xf32>
    %63 = vector.broadcast %60 : vector<1x128xf32> to vector<16x128xf32>
    %64 = arith.addf %62, %63 : vector<16x128xf32>
    %cst_24 = arith.constant 0.000000e+00 : f32
    %65 = vector.broadcast %cst_24 : f32 to vector<16x128xf32>
    %66 = arith.maximumf %64, %65 : vector<16x128xf32>
    %67 = vector.broadcast %4 : vector<16x1xf32> to vector<16x128xf32>
    %68 = arith.mulf %66, %67 : vector<16x128xf32>
    %69 = arith.truncf %68 : vector<16x128xf32> to vector<16x128xbf16>
    %c0_25 = arith.constant 0 : index
    %c0_26 = arith.constant 0 : index
    %70 = vector.load %arg3[%c0_25, %c0_26] : memref<128x128xbf16, #tpu.memory_space<vmem>>, vector<128x128xbf16>
    %cst_27 = arith.constant dense<0.000000e+00> : vector<16x128xf32>
    %71 = tpu.matmul %69, %70, %cst_27 {dimension_numbers = #tpu.dot_dimension_numbers<[1], [0], [0], [1], [0, 0, 1, 1], [], []>} : vector<16x128xbf16>, vector<128x128xbf16>, vector<16x128xf32> -> vector<16x128xf32>
    %cst_28 = arith.constant dense<0.000000e+00> : vector<128xf32>
    %72 = vector.multi_reduction <add>, %71, %cst_28 [0] : vector<16x128xf32> to vector<128xf32>
    %73 = vector.shape_cast %72 : vector<128xf32> to vector<1x128xf32>
    %74 = arith.mulf %71, %71 : vector<16x128xf32>
    %cst_29 = arith.constant dense<0.000000e+00> : vector<128xf32>
    %75 = vector.multi_reduction <add>, %74, %cst_29 [0] : vector<16x128xf32> to vector<128xf32>
    %76 = vector.shape_cast %75 : vector<128xf32> to vector<1x128xf32>
    %cst_30 = arith.constant 1.250000e-01 : f32
    %77 = vector.broadcast %cst_30 : f32 to vector<1x128xf32>
    %78 = arith.mulf %73, %77 : vector<1x128xf32>
    %cst_31 = arith.constant 1.250000e-01 : f32
    %79 = vector.broadcast %cst_31 : f32 to vector<1x128xf32>
    %80 = arith.mulf %76, %79 : vector<1x128xf32>
    %81 = arith.mulf %78, %78 : vector<1x128xf32>
    %82 = arith.subf %80, %81 : vector<1x128xf32>
    %cst_32 = arith.constant 0.000000e+00 : f32
    %83 = vector.broadcast %cst_32 : f32 to vector<1x128xf32>
    %84 = arith.maximumf %82, %83 : vector<1x128xf32>
    %c4 = arith.constant 4 : index
    %c0_33 = arith.constant 0 : index
    %85 = vector.load %arg5[%c4, %c0_33] : memref<8x128xf32, #tpu.memory_space<vmem>>, vector<1x128xf32>
    %c5 = arith.constant 5 : index
    %c0_34 = arith.constant 0 : index
    %86 = vector.load %arg5[%c5, %c0_34] : memref<8x128xf32, #tpu.memory_space<vmem>>, vector<1x128xf32>
    %cst_35 = arith.constant 9.99999974E-6 : f32
    %87 = vector.broadcast %cst_35 : f32 to vector<1x128xf32>
    %88 = arith.addf %84, %87 : vector<1x128xf32>
    %89 = math.rsqrt %88 : vector<1x128xf32>
    %90 = arith.mulf %85, %89 : vector<1x128xf32>
    %91 = arith.mulf %78, %90 : vector<1x128xf32>
    %92 = arith.subf %86, %91 : vector<1x128xf32>
    %93 = vector.broadcast %90 : vector<1x128xf32> to vector<16x128xf32>
    %94 = arith.mulf %71, %93 : vector<16x128xf32>
    %95 = vector.broadcast %92 : vector<1x128xf32> to vector<16x128xf32>
    %96 = arith.addf %94, %95 : vector<16x128xf32>
    %cst_36 = arith.constant 0.000000e+00 : f32
    %97 = vector.broadcast %cst_36 : f32 to vector<16x128xf32>
    %98 = arith.maximumf %96, %97 : vector<16x128xf32>
    %99 = vector.broadcast %4 : vector<16x1xf32> to vector<16x128xf32>
    %100 = arith.mulf %98, %99 : vector<16x128xf32>
    %101 = arith.truncf %100 : vector<16x128xf32> to vector<16x128xbf16>
    %c0_37 = arith.constant 0 : index
    %c0_38 = arith.constant 0 : index
    %102 = vector.load %arg4[%c0_37, %c0_38] : memref<128x128xbf16, #tpu.memory_space<vmem>>, vector<128x128xbf16>
    %cst_39 = arith.constant dense<0.000000e+00> : vector<16x128xf32>
    %103 = tpu.matmul %101, %102, %cst_39 {dimension_numbers = #tpu.dot_dimension_numbers<[1], [0], [0], [1], [0, 0, 1, 1], [], []>} : vector<16x128xbf16>, vector<128x128xbf16>, vector<16x128xf32> -> vector<16x128xf32>
    %cst_40 = arith.constant dense<0.000000e+00> : vector<128xf32>
    %104 = vector.multi_reduction <add>, %103, %cst_40 [0] : vector<16x128xf32> to vector<128xf32>
    %105 = vector.shape_cast %104 : vector<128xf32> to vector<1x128xf32>
    %106 = arith.mulf %103, %103 : vector<16x128xf32>
    %cst_41 = arith.constant dense<0.000000e+00> : vector<128xf32>
    %107 = vector.multi_reduction <add>, %106, %cst_41 [0] : vector<16x128xf32> to vector<128xf32>
    %108 = vector.shape_cast %107 : vector<128xf32> to vector<1x128xf32>
    %cst_42 = arith.constant 1.250000e-01 : f32
    %109 = vector.broadcast %cst_42 : f32 to vector<1x128xf32>
    %110 = arith.mulf %105, %109 : vector<1x128xf32>
    %cst_43 = arith.constant 1.250000e-01 : f32
    %111 = vector.broadcast %cst_43 : f32 to vector<1x128xf32>
    %112 = arith.mulf %108, %111 : vector<1x128xf32>
    %113 = arith.mulf %110, %110 : vector<1x128xf32>
    %114 = arith.subf %112, %113 : vector<1x128xf32>
    %cst_44 = arith.constant 0.000000e+00 : f32
    %115 = vector.broadcast %cst_44 : f32 to vector<1x128xf32>
    %116 = arith.maximumf %114, %115 : vector<1x128xf32>
    %c6 = arith.constant 6 : index
    %c0_45 = arith.constant 0 : index
    %117 = vector.load %arg5[%c6, %c0_45] : memref<8x128xf32, #tpu.memory_space<vmem>>, vector<1x128xf32>
    %c7 = arith.constant 7 : index
    %c0_46 = arith.constant 0 : index
    %118 = vector.load %arg5[%c7, %c0_46] : memref<8x128xf32, #tpu.memory_space<vmem>>, vector<1x128xf32>
    %cst_47 = arith.constant 9.99999974E-6 : f32
    %119 = vector.broadcast %cst_47 : f32 to vector<1x128xf32>
    %120 = arith.addf %116, %119 : vector<1x128xf32>
    %121 = math.rsqrt %120 : vector<1x128xf32>
    %122 = arith.mulf %117, %121 : vector<1x128xf32>
    %123 = arith.mulf %110, %122 : vector<1x128xf32>
    %124 = arith.subf %118, %123 : vector<1x128xf32>
    %125 = vector.broadcast %122 : vector<1x128xf32> to vector<16x128xf32>
    %126 = arith.mulf %103, %125 : vector<16x128xf32>
    %127 = vector.broadcast %124 : vector<1x128xf32> to vector<16x128xf32>
    %128 = arith.addf %126, %127 : vector<16x128xf32>
    %c0_48 = arith.constant 0 : index
    %c0_49 = arith.constant 0 : index
    %129 = vector.load %arg6[%c0_48, %c0_49] : memref<16x128xf32, #tpu.memory_space<vmem>>, vector<16x128xf32>
    tpu.vector_store %arg6[%c0_48, %c0_49], %128 {strides = array<i32>} : memref<16x128xf32, #tpu.memory_space<vmem>>, vector<16x128xf32>,
    return
  }
}

</mosaic_0001>

<bundles_post_ra>
// kernel: _mlp_forward_impl.1
= control target key start
LH: loop header
LB: loop body
LE: loop exit
PB: predicated region body
PF: predicated region fallthrough
CT: control target
= control target key end

     0   :  { %11 = vsyncpa [#allocation3], 0  ;;  %s978_s0 = inlined_call_operand.vmem [shape: bf16[16,128], index: 0, kind: input, shape index: {}]   ;;  %s979_s1 = inlined_call_operand.hbm [shape: bf16[128,128], index: 1, kind: input, shape index: {}]   ;;  %s980_s2 = inlined_call_operand.hbm [shape: bf16[128,128], index: 2, kind: input, shape index: {}]   ;;  %s981_s3 = inlined_call_operand.hbm [shape: bf16[128,128], index: 3, kind: input, shape index: {}]   ;;  %s982_s4 = inlined_call_operand.hbm [shape: bf16[128,128], index: 4, kind: input, shape index: {}]   ;;  %s983_s5 = inlined_call_operand.vmem [shape: f32[8,128], index: 5, kind: input, shape index: {}]   ;;  %s984_s6 = inlined_call_operand.vmem [shape: f32[16,128], index: 6, kind: output, shape index: {}]  }
   0x1   :  { %12 = vsyncpa [#allocation5], 0 }
   0x2   :  { %13 = vsyncpa [#allocation8], 0  ;;  %s33_s23 = sshll.u32 %s980_s2, 4  ;;  %s892_s24 = smov [#allocation4]   ;;  %s34_s23 = int_to_ptr.hbm [resolvable:$true] %s33_s23 }
   0x3   :  { %s35_s25 = sshll.u32 %s892_s24, 4  ;;  %s20_s28 = sshll.u32 %s979_s1, 4  ;;  %s36_s25 = int_to_ptr.vmem [resolvable:$true] %s35_s25  ;;  %s21_s28 = int_to_ptr.hbm [resolvable:$true] %s20_s28 }
   0x4   :  { %s893_s29 = smov 64   ;;  %s894_s30 = smov 4  }
   0x5   :  { %41 = dma.hbm_to_vmem [thread:$0]  %s34_s23, 1024, %s36_s25, [#allocation5], %s893_s29, %s893_s29, %s894_s30  }
   0x6   :  { %s895_s7 = smov [#allocation2]   ;;  %s46_s11 = sshll.u32 %s981_s3, 4  ;;  %s47_s11 = int_to_ptr.hbm [resolvable:$true] %s46_s11 }
   0x7   :  { %s22_s8 = sshll.u32 %s895_s7, 4  ;;  %s59_s13 = sshll.u32 %s982_s4, 4  ;;  %s23_s8 = int_to_ptr.vmem [resolvable:$true] %s22_s8  ;;  %s60_s13 = int_to_ptr.hbm [resolvable:$true] %s59_s13 }
   0x8   :  { %28 = dma.hbm_to_vmem [thread:$0]  %s21_s28, 1024, %s23_s8, [#allocation3], %s893_s29, %s893_s29, %s894_s30  }
   0x9   :  { %s896_s14 = smov [#allocation6]   ;;  %s897_s1 = smov [#allocation7]  }
   0xa   :  { %s48_s15 = sshll.u32 %s896_s14, 4  ;;  %s61_s16 = sshll.u32 %s897_s1, 4  ;;  %s49_s15 = int_to_ptr.vmem [resolvable:$true] %s48_s15  ;;  %s62_s16 = int_to_ptr.vmem [resolvable:$true] %s61_s16 }
   0xb   :  { %54 = dma.hbm_to_vmem [thread:$0]  %s47_s11, 1024, %s49_s15, [#allocation5], %s893_s29, %s893_s29, %s894_s30  }
   0xc   :  { %67 = dma.hbm_to_vmem [thread:$0]  %s60_s13, 1024, %s62_s16, [#allocation8], %s893_s29, %s893_s29, %s894_s30  }
   0xd   :  { %886 = dma.done.wait [#allocation3], 1024  }
   0xe   :  { %887 = vsyncadd [#allocation3], 4294966272 }
   0xf   :  { %888 = dma.done.wait [#allocation5], 2048  }
  0x10   :  { %889 = vsyncadd [#allocation5], 4294965248 }
  0x11   :  { %890 = dma.done.wait [#allocation8], 1024  }
  0x12   :  { %891 = vsyncadd [#allocation8], 4294966272  ;;  %v751_v0 = vld [vmem:[#allocation2 + $0x38] sm:$0xff]  ;;  %v750_v1 = vld [vmem:[#allocation2 + $0x30] sm:$0xff] }
  0x13   :  { %167 = vmatpush.bf16.msra.mxu0 %v751_v0  ;;  %v749_v2 = vld [vmem:[#allocation2 + $0x28] sm:$0xff]  ;;  %v748_v3 = vld [vmem:[#allocation2 + $0x20] sm:$0xff]  ;;  %v747_v4 = vld [vmem:[#allocation2 + $0x18] sm:$0xff] }
  0x14   :  { %v746_v5 = vld [vmem:[#allocation2 + $0x10] sm:$0xff]  ;;  %v745_v6 = vld [vmem:[#allocation2 + $0x8] sm:$0xff]  ;;  %v744_v7 = vld [vmem:[#allocation2] sm:$0xff] }
  0x15   :  { %v743_v8 = vld [vmem:[%s978_s0] sm:$0xff]  ;;  %v759_v10 = vld [vmem:[#allocation4 + $0x38] sm:$0xff]  ;;  %v758_v11 = vld [vmem:[#allocation4 + $0x30] sm:$0xff] }
  0x16   :  { %293 = vmatpush.bf16.msra.mxu1 %v759_v10  ;;  %v757_v16 = vld [vmem:[#allocation4 + $0x28] sm:$0xff]  ;;  %v756_v21 = vld [vmem:[#allocation4 + $0x20] sm:$0xff]  ;;  %v755_v26 = vld [vmem:[#allocation4 + $0x18] sm:$0xff] }
  0x17   :  { %168 = vmatpush.bf16.msra.mxu0 %v750_v1  ;;  %v754_v31 = vld [vmem:[#allocation4 + $0x10] sm:$0xff]  ;;  %v753_v36 = vld [vmem:[#allocation4 + $0x8] sm:$0xff]  ;;  %v752_v38 = vld [vmem:[#allocation4] sm:$0xff] }
  0x18   :  { %v202_v46 = vld [vmem:[%s983_s5] sm:$0x1]  ;;  %v203_v50 = vld [vmem:[%s983_s5 + $0x1] sm:$0x1]  ;;  %v767_v0 = vld [vmem:[#allocation6 + $0x38] sm:$0xff] }
  0x19   :  { %419 = vmatpush.bf16.msra.mxu2 %v767_v0  ;;  %v766_v1 = vld [vmem:[#allocation6 + $0x30] sm:$0xff] }
  0x1a   :  { %294 = vmatpush.bf16.msra.mxu1 %v758_v11  ;;  %v764_v11 = vld [vmem:[#allocation6 + $0x20] sm:$0xff] }
  0x1b   :  { %169 = vmatpush.bf16.msra.mxu0 %v749_v2 }
  0x1d   :  { %420 = vmatpush.bf16.msra.mxu2 %v766_v1  ;;  %v772_v1 = vld [vmem:[#allocation7 + $0x20] sm:$0xff] }
  0x1e   :  { %295 = vmatpush.bf16.msra.mxu1 %v757_v16  ;;  %v763_v16 = vld [vmem:[#allocation6 + $0x18] sm:$0xff] }
  0x1f   :  { %170 = vmatpush.bf16.msra.mxu0 %v748_v3 }
  0x22   :  { %296 = vmatpush.bf16.msra.mxu1 %v756_v21  ;;  %v762_v21 = vld [vmem:[#allocation6 + $0x10] sm:$0xff] }
  0x23   :  { %171 = vmatpush.bf16.msra.mxu0 %v747_v4 }
  0x26   :  { %297 = vmatpush.bf16.msra.mxu1 %v755_v26  ;;  %v761_v26 = vld [vmem:[#allocation6 + $0x8] sm:$0xff] }
  0x27   :  { %172 = vmatpush.bf16.msra.mxu0 %v746_v5 }
  0x2a   :  { %298 = vmatpush.bf16.msra.mxu1 %v754_v31 }
  0x2b   :  { %173 = vmatpush.bf16.msra.mxu0 %v745_v6  ;;  %v765_v6 = vld [vmem:[#allocation6 + $0x28] sm:$0xff] }
  0x2c   :  { %421 = vmatpush.bf16.msra.mxu2 %v765_v6  ;;  %v771_v6 = vld [vmem:[#allocation7 + $0x18] sm:$0xff] }
  0x2e   :  { %299 = vmatpush.bf16.msra.mxu1 %v753_v36  ;;  %v328_v36 = vld [vmem:[%s983_s5 + $0x2] sm:$0x1] }
  0x2f   :  { %174 = vmatpush.bf16.msra.mxu0 %v744_v7 }
  0x30   :  { %422 = vmatpush.bf16.msra.mxu2 %v764_v11  ;;  %v770_v11 = vld [vmem:[#allocation7 + $0x10] sm:$0xff] }
  0x32   :  { %175 = vmatmul.bf16.vlgmr.msra.gmra.mxu0 %v743_v8  ;;  %300 = vmatpush.bf16.msra.mxu1 %v752_v38 }
  0x34   :  { %423 = vmatpush.bf16.msra.mxu2 %v763_v16  ;;  %v769_v16 = vld [vmem:[#allocation7 + $0x8] sm:$0xff] }
  0x38   :  { %424 = vmatpush.bf16.msra.mxu2 %v762_v21 }
  0x3c   :  { %425 = vmatpush.bf16.msra.mxu2 %v761_v26  ;;  %v454_v26 = vld [vmem:[%s983_s5 + $0x4] sm:$0x1] }
  0xaf   :  { %v176_v9 = vpop.f32.mrf.mxu0 }
  0xb0   :  { %v188_v13 = vmul.f32 %v176_v9, %v176_v9 }
  0xb7   :  { %v178_v12 = vpop.f32.mrf.mxu0 }
  0xb8   :  { %v181_v14 = vadd.f32 %v178_v12, %v176_v9  ;;  %v189_v15 = vmul.f32 %v178_v12, %v178_v12 }
  0xba   :  { %v182_v17 = vrot.slane %v181_v14, 4  ;;  %v190_v18 = vadd.f32 %v189_v15, %v188_v13 }
  0xbc   :  { %v183_v19 = vadd.f32 %v182_v17, %v181_v14  ;;  %v191_v20 = vrot.slane %v190_v18, 4 }
  0xbe   :  { %v184_v22 = vrot.slane %v183_v19, 2  ;;  %v192_v23 = vadd.f32 %v191_v20, %v190_v18 }
  0xc0   :  { %v185_v24 = vadd.f32 %v184_v22, %v183_v19  ;;  %v193_v25 = vrot.slane %v192_v23, 2 }
  0xc2   :  { %v186_v27 = vrot.slane %v185_v24, 1  ;;  %v194_v28 = vadd.f32 %v193_v25, %v192_v23 }
  0xc4   :  { %v187_v29 = vadd.f32 %v186_v27, %v185_v24  ;;  %v195_v30 = vrot.slane %v194_v28, 1 }
  0xc6   :  { %v196_v32 = vadd.f32 %v195_v30, %v194_v28  ;;  %v197_v33 = vmul.f32 0.125, %v187_v29  ;;  %v760_v28 = vld [vmem:[#allocation6] sm:$0xff] }
  0xc7   :  { %426 = vmatpush.bf16.msra.mxu2 %v760_v28 }
  0xc8   :  { %v198_v34 = vmul.f32 0.125, %v196_v32  ;;  %v199_v35 = vmul.f32 %v197_v33, %v197_v33 }
  0xca   :  { %v200_v37 = vsub.f32 %v198_v34, %v199_v35 }
  0xcc   :  { %v201_v39 = vmax.f32 %v200_v37, 0.0 }
  0xce   :  { %v204_v40 = vadd.f32 1e-05, %v201_v39 }
  0xd0   :  { %782 = vrsqrt.f32 %v204_v40  ;;  %vm211_vm1 = vweird.f32 %v204_v40 }
  0xd6   :  { %v783_v41 = vpop.eup %782 }
  0xd7   :  { %v206_v42 = vmul.f32 %v783_v41, %v204_v40  ;;  %vm212_vm0 = vweird.f32 %v783_v41  ;;  %v329_v40 = vld [vmem:[%s983_s5 + $0x3] sm:$0x1] }
  0xd8   :  { %vm213_vm2 = vmor %vm211_vm1, %vm212_vm0 }
  0xd9   :  { %v207_v43 = vmul.f32 %v783_v41, %v206_v42 }
  0xdb   :  { %v208_v44 = vmul.f32 0.5, %v207_v43 }
  0xdd   :  { %v209_v45 = vsub.f32 1.5, %v208_v44 }
  0xdf   :  { %v210_v47 = vmul.f32 %v783_v41, %v209_v45 }
  0xe1   :  { %v214_v48 = vsel %vm213_vm2, %v783_v41, %v210_v47 }
  0xe2   :  { %v215_v49 = vmul.f32 %v214_v48, %v202_v46 }
  0xe4   :  { %v216_v51 = vmul.f32 %v215_v49, %v197_v33  ;;  %v218_v52 = vperm.slane %v215_v49, 0 }
  0xe6   :  { %v217_v53 = vsub.f32 %v203_v50, %v216_v51  ;;  %v219_v54 = vmul.f32 %v218_v52, %v176_v9  ;;  %v220_v55 = vmul.f32 %v218_v52, %v178_v12 }
  0xe8   :  { %v221_v56 = vperm.slane %v217_v53, 0 }
  0xea   :  { %v223_v57 = vadd.f32 %v221_v56, %v220_v55  ;;  %v222_v58 = vadd.f32 %v221_v56, %v219_v54  ;;  %v775_v54 = vld [vmem:[#allocation7 + $0x38] sm:$0xff]  ;;  %v774_v55 = vld [vmem:[#allocation7 + $0x30] sm:$0xff] }
  0xeb   :  { %545 = vmatpush.bf16.msra.mxu3 %v775_v54 }
  0xec   :  { %v225_v59 = vmax.f32 %v223_v57, 0.0  ;;  %v224_v60 = vmax.f32 %v222_v58, 0.0 }
  0xee   :  { %v227_v61 = vmul.f32 0.0, %v225_v59 }
  0xef   :  { %546 = vmatpush.bf16.msra.mxu3 %v774_v55 }
  0xf0   :  { %v228_v62 = vpack.c.bf16 %v227_v61, %v224_v60  ;;  %v773_v60 = vld [vmem:[#allocation7 + $0x28] sm:$0xff] }
  0xf2   :  { %301 = vmatmul.bf16.vlgmr.msra.gmra.mxu1 %v228_v62 }
  0xf3   :  { %547 = vmatpush.bf16.msra.mxu3 %v773_v60 }
  0xf7   :  { %548 = vmatpush.bf16.msra.mxu3 %v772_v1 }
  0xfb   :  { %549 = vmatpush.bf16.msra.mxu3 %v771_v6 }
  0xff   :  { %550 = vmatpush.bf16.msra.mxu3 %v770_v11 }
 0x103   :  { %551 = vmatpush.bf16.msra.mxu3 %v769_v16 }
 0x16f   :  { %v302_v63 = vpop.f32.mrf.mxu1 }
 0x170   :  { %v314_v3 = vmul.f32 %v302_v63, %v302_v63 }
 0x177   :  { %v304_v2 = vpop.f32.mrf.mxu1 }
 0x178   :  { %v307_v4 = vadd.f32 %v304_v2, %v302_v63  ;;  %v315_v5 = vmul.f32 %v304_v2, %v304_v2 }
 0x17a   :  { %v308_v7 = vrot.slane %v307_v4, 4  ;;  %v316_v8 = vadd.f32 %v315_v5, %v314_v3 }
 0x17c   :  { %v309_v9 = vadd.f32 %v308_v7, %v307_v4  ;;  %v317_v10 = vrot.slane %v316_v8, 4 }
 0x17e   :  { %v310_v12 = vrot.slane %v309_v9, 2  ;;  %v318_v13 = vadd.f32 %v317_v10, %v316_v8 }
 0x180   :  { %v311_v14 = vadd.f32 %v310_v12, %v309_v9  ;;  %v319_v15 = vrot.slane %v318_v13, 2 }
 0x182   :  { %v312_v17 = vrot.slane %v311_v14, 1  ;;  %v320_v18 = vadd.f32 %v319_v15, %v318_v13 }
 0x184   :  { %v313_v19 = vadd.f32 %v312_v17, %v311_v14  ;;  %v321_v20 = vrot.slane %v320_v18, 1 }
 0x186   :  { %v322_v22 = vadd.f32 %v321_v20, %v320_v18  ;;  %v323_v23 = vmul.f32 0.125, %v313_v19  ;;  %v768_v18 = vld [vmem:[#allocation7] sm:$0xff] }
 0x187   :  { %552 = vmatpush.bf16.msra.mxu3 %v768_v18 }
 0x188   :  { %v324_v24 = vmul.f32 0.125, %v322_v22  ;;  %v325_v25 = vmul.f32 %v323_v23, %v323_v23 }
 0x18a   :  { %v326_v27 = vsub.f32 %v324_v24, %v325_v25 }
 0x18c   :  { %v327_v29 = vmax.f32 %v326_v27, 0.0 }
 0x18e   :  { %v330_v30 = vadd.f32 1e-05, %v327_v29 }
 0x190   :  { %784 = vrsqrt.f32 %v330_v30  ;;  %vm337_vm4 = vweird.f32 %v330_v30 }
 0x196   :  { %v785_v31 = vpop.eup %784 }
 0x197   :  { %v332_v32 = vmul.f32 %v785_v31, %v330_v30  ;;  %vm338_vm3 = vweird.f32 %v785_v31  ;;  %v455_v30 = vld [vmem:[%s983_s5 + $0x5] sm:$0x1] }
 0x198   :  { %vm339_vm5 = vmor %vm337_vm4, %vm338_vm3 }
 0x199   :  { %v333_v33 = vmul.f32 %v785_v31, %v332_v32 }
 0x19b   :  { %v334_v34 = vmul.f32 0.5, %v333_v33 }
 0x19d   :  { %v335_v35 = vsub.f32 1.5, %v334_v34 }
 0x19f   :  { %v336_v37 = vmul.f32 %v785_v31, %v335_v35 }
 0x1a1   :  { %v340_v38 = vsel %vm339_vm5, %v785_v31, %v336_v37 }
 0x1a2   :  { %v341_v39 = vmul.f32 %v340_v38, %v328_v36 }
 0x1a4   :  { %v342_v41 = vmul.f32 %v341_v39, %v323_v23  ;;  %v344_v42 = vperm.slane %v341_v39, 0 }
 0x1a6   :  { %v343_v43 = vsub.f32 %v329_v40, %v342_v41  ;;  %v345_v44 = vmul.f32 %v344_v42, %v302_v63  ;;  %v346_v45 = vmul.f32 %v344_v42, %v304_v2 }
 0x1a8   :  { %v347_v46 = vperm.slane %v343_v43, 0 }
 0x1aa   :  { %v349_v47 = vadd.f32 %v347_v46, %v346_v45  ;;  %v348_v48 = vadd.f32 %v347_v46, %v345_v44 }
 0x1ac   :  { %v351_v49 = vmax.f32 %v349_v47, 0.0  ;;  %v350_v50 = vmax.f32 %v348_v48, 0.0 }
 0x1ae   :  { %v353_v51 = vmul.f32 0.0, %v351_v49 }
 0x1b0   :  { %v354_v52 = vpack.c.bf16 %v353_v51, %v350_v50 }
 0x1b2   :  { %427 = vmatmul.bf16.vlgmr.msra.gmra.mxu2 %v354_v52 }
 0x235   :  { %v428_v53 = vpop.f32.mrf.mxu2 }
 0x236   :  { %v440_v57 = vmul.f32 %v428_v53, %v428_v53 }
 0x23d   :  { %v430_v56 = vpop.f32.mrf.mxu2 }
 0x23e   :  { %v433_v58 = vadd.f32 %v430_v56, %v428_v53  ;;  %v441_v59 = vmul.f32 %v430_v56, %v430_v56 }
 0x240   :  { %v434_v61 = vrot.slane %v433_v58, 4  ;;  %v442_v62 = vadd.f32 %v441_v59, %v440_v57 }
 0x242   :  { %v435_v63 = vadd.f32 %v434_v61, %v433_v58  ;;  %v443_v0 = vrot.slane %v442_v62, 4 }
 0x244   :  { %v436_v2 = vrot.slane %v435_v63, 2  ;;  %v444_v3 = vadd.f32 %v443_v0, %v442_v62 }
 0x246   :  { %v437_v4 = vadd.f32 %v436_v2, %v435_v63  ;;  %v445_v5 = vrot.slane %v444_v3, 2 }
 0x248   :  { %v438_v7 = vrot.slane %v437_v4, 1  ;;  %v446_v8 = vadd.f32 %v445_v5, %v444_v3 }
 0x24a   :  { %v439_v9 = vadd.f32 %v438_v7, %v437_v4  ;;  %v447_v10 = vrot.slane %v446_v8, 1 }
 0x24c   :  { %v448_v12 = vadd.f32 %v447_v10, %v446_v8  ;;  %v449_v13 = vmul.f32 0.125, %v439_v9  ;;  %v580_v8 = vld [vmem:[%s983_s5 + $0x6] sm:$0x1] }
 0x24e   :  { %v450_v14 = vmul.f32 0.125, %v448_v12  ;;  %v451_v15 = vmul.f32 %v449_v13, %v449_v13  ;;  %v581_v12 = vld [vmem:[%s983_s5 + $0x7] sm:$0x1] }
 0x250   :  { %v452_v17 = vsub.f32 %v450_v14, %v451_v15 }
 0x252   :  { %v453_v19 = vmax.f32 %v452_v17, 0.0 }
 0x254   :  { %v456_v20 = vadd.f32 1e-05, %v453_v19 }
 0x256   :  { %786 = vrsqrt.f32 %v456_v20  ;;  %vm463_vm7 = vweird.f32 %v456_v20 }
 0x25c   :  { %v787_v21 = vpop.eup %786 }
 0x25d   :  { %v458_v22 = vmul.f32 %v787_v21, %v456_v20  ;;  %vm464_vm6 = vweird.f32 %v787_v21 }
 0x25e   :  { %vm465_vm8 = vmor %vm463_vm7, %vm464_vm6 }
 0x25f   :  { %v459_v23 = vmul.f32 %v787_v21, %v458_v22 }
 0x261   :  { %v460_v24 = vmul.f32 0.5, %v459_v23 }
 0x263   :  { %v461_v25 = vsub.f32 1.5, %v460_v24 }
 0x265   :  { %v462_v27 = vmul.f32 %v787_v21, %v461_v25 }
 0x267   :  { %v466_v28 = vsel %vm465_vm8, %v787_v21, %v462_v27 }
 0x268   :  { %v467_v29 = vmul.f32 %v466_v28, %v454_v26 }
 0x26a   :  { %v468_v31 = vmul.f32 %v467_v29, %v449_v13  ;;  %v470_v32 = vperm.slane %v467_v29, 0 }
 0x26c   :  { %v469_v33 = vsub.f32 %v455_v30, %v468_v31  ;;  %v471_v34 = vmul.f32 %v470_v32, %v428_v53  ;;  %v472_v35 = vmul.f32 %v470_v32, %v430_v56 }
 0x26e   :  { %v473_v36 = vperm.slane %v469_v33, 0 }
 0x270   :  { %v475_v37 = vadd.f32 %v473_v36, %v472_v35  ;;  %v474_v38 = vadd.f32 %v473_v36, %v471_v34 }
 0x272   :  { %v477_v39 = vmax.f32 %v475_v37, 0.0  ;;  %v476_v40 = vmax.f32 %v474_v38, 0.0 }
 0x274   :  { %v479_v41 = vmul.f32 0.0, %v477_v39 }
 0x276   :  { %v480_v42 = vpack.c.bf16 %v479_v41, %v476_v40 }
 0x278   :  { %553 = vmatmul.bf16.vlgmr.msra.gmra.mxu3 %v480_v42 }
 0x2fb   :  { %v554_v43 = vpop.f32.mrf.mxu3 }
 0x2fc   :  { %v566_v45 = vmul.f32 %v554_v43, %v554_v43 }
 0x303   :  { %v556_v44 = vpop.f32.mrf.mxu3 }
 0x304   :  { %v559_v46 = vadd.f32 %v556_v44, %v554_v43  ;;  %v567_v47 = vmul.f32 %v556_v44, %v556_v44 }
 0x306   :  { %v560_v48 = vrot.slane %v559_v46, 4  ;;  %v568_v49 = vadd.f32 %v567_v47, %v566_v45 }
 0x308   :  { %v561_v50 = vadd.f32 %v560_v48, %v559_v46  ;;  %v569_v51 = vrot.slane %v568_v49, 4 }
 0x30a   :  { %v562_v52 = vrot.slane %v561_v50, 2  ;;  %v570_v53 = vadd.f32 %v569_v51, %v568_v49 }
 0x30c   :  { %v563_v54 = vadd.f32 %v562_v52, %v561_v50  ;;  %v571_v55 = vrot.slane %v570_v53, 2 }
 0x30e   :  { %v564_v56 = vrot.slane %v563_v54, 1  ;;  %v572_v57 = vadd.f32 %v571_v55, %v570_v53 }
 0x310   :  { %v565_v58 = vadd.f32 %v564_v56, %v563_v54  ;;  %v573_v59 = vrot.slane %v572_v57, 1 }
 0x312   :  { %v574_v60 = vadd.f32 %v573_v59, %v572_v57  ;;  %v575_v61 = vmul.f32 0.125, %v565_v58 }
 0x314   :  { %v576_v62 = vmul.f32 0.125, %v574_v60  ;;  %v577_v63 = vmul.f32 %v575_v61, %v575_v61 }
 0x316   :  { %v578_v0 = vsub.f32 %v576_v62, %v577_v63 }
 0x318   :  { %v579_v1 = vmax.f32 %v578_v0, 0.0 }
 0x31a   :  { %v582_v2 = vadd.f32 1e-05, %v579_v1 }
 0x31c   :  { %788 = vrsqrt.f32 %v582_v2  ;;  %vm589_vm10 = vweird.f32 %v582_v2 }
 0x322   :  { %v789_v3 = vpop.eup %788 }
 0x323   :  { %v584_v4 = vmul.f32 %v789_v3, %v582_v2  ;;  %vm590_vm9 = vweird.f32 %v789_v3 }
 0x324   :  { %vm591_vm11 = vmor %vm589_vm10, %vm590_vm9 }
 0x325   :  { %v585_v5 = vmul.f32 %v789_v3, %v584_v4 }
 0x327   :  { %v586_v6 = vmul.f32 0.5, %v585_v5 }
 0x329   :  { %v587_v7 = vsub.f32 1.5, %v586_v6 }
 0x32b   :  { %v588_v9 = vmul.f32 %v789_v3, %v587_v7 }
 0x32d   :  { %v592_v10 = vsel %vm591_vm11, %v789_v3, %v588_v9 }
 0x32e   :  { %v593_v11 = vmul.f32 %v592_v10, %v580_v8 }
 0x330   :  { %v594_v13 = vmul.f32 %v593_v11, %v575_v61  ;;  %v596_v14 = vperm.slane %v593_v11, 0 }
 0x332   :  { %v595_v15 = vsub.f32 %v581_v12, %v594_v13  ;;  %v597_v16 = vmul.f32 %v596_v14, %v554_v43  ;;  %v598_v17 = vmul.f32 %v596_v14, %v556_v44 }
 0x334   :  { %v599_v18 = vperm.slane %v595_v15, 0 }
 0x336   :  { %v600_v19 = vadd.f32 %v599_v18, %v597_v16  ;;  %v601_v20 = vadd.f32 %v599_v18, %v598_v17 }
 0x338   :  { %602 = vst [vmem:[%s984_s6] sm:$0xff] %v600_v19 }
 0x339   :  { %603 = vst [vmem:[%s984_s6 + $0x8] sm:$0xff] %v601_v20 }
 0x33a   :  { %608 = vsyncpa [#allocation3], 1 }
 0x33b   :  { %609 = vsyncpa [#allocation5], 1 }
 0x33c   :  { %610 = vsyncpa [#allocation8], 1 }

</bundles_post_ra>
